<compile_context>
chip_gen: v6e
topology: v6e:2x2x1
jax: 0.10.0
libtpu: 0.0.40
codegen_flags: <defaults>
</compile_context>

<pallas_src>
import functools

import jax
import jax.numpy as jnp
from jax.experimental import pallas as pl
from jax.experimental.pallas import tpu as pltpu


# ----------------------------------------------------------------------------
# Linear: y = x @ w + b   (w is the transposed nn.Linear weight, [in, out])
# ----------------------------------------------------------------------------

def _linear_kernel(x_ref, w_ref, b_ref, o_ref):
    # bf16 MXU inputs, f32 accumulation, bias fused in the epilogue.
    acc = jnp.dot(x_ref[...], w_ref[...], preferred_element_type=jnp.float32)
    o_ref[...] = (acc + b_ref[...]).astype(o_ref.dtype)


def linear(x2d_bf16, w_t_bf16, b, *, out_dtype=jnp.bfloat16, row_tile=512):
    """x2d_bf16: [M, K] bf16, w_t_bf16: [K, N] bf16, b: [N] -> [M, N] out_dtype."""
    M, K = x2d_bf16.shape
    N = w_t_bf16.shape[1]
    tm = M if M <= row_tile else row_tile
    Mp = pl.cdiv(M, tm) * tm
    x_in = x2d_bf16 if Mp == M else jnp.pad(x2d_bf16, ((0, Mp - M), (0, 0)))
    out = pl.pallas_call(
        _linear_kernel,
        out_shape=jax.ShapeDtypeStruct((Mp, N), out_dtype),
        grid=(Mp // tm,),
        in_specs=[pl.BlockSpec((tm, K), lambda i: (i, 0)),
                  pl.BlockSpec((K, N), lambda i: (0, 0)),    # weights resident
                  pl.BlockSpec((1, N), lambda i: (0, 0))],
        out_specs=pl.BlockSpec((tm, N), lambda i: (i, 0)),
        compiler_params=pltpu.CompilerParams(
            dimension_semantics=("parallel",)),
    )(x_in, w_t_bf16, b.reshape(1, N).astype(jnp.float32))
    return out if Mp == M else out[:M]


# ----------------------------------------------------------------------------
# Attention core + fused output projection.
# Grid: (batch, Nq tiles). Heads are split with static column slices inside
# the kernel; per-head results stream into a VMEM scratch, then one projection
# matmul produces a single lane-dense (TQ, C) store.
# ----------------------------------------------------------------------------

def _cross_attn_kernel(q_ref, kv_ref, pw_ref, pb_ref, o_ref, acc_ref, *, num_heads):
    C = q_ref.shape[-1]
    Dh = C // num_heads
    q = q_ref[0]      # (TQ, C) bf16; 1/sqrt(Dh) already folded into the q projection
    kv = kv_ref[0]    # (Nk, 2C) bf16: k = [:, :C], v = [:, C:]

    for h in range(num_heads):                       # static unroll over heads
        lo, hi = h * Dh, (h + 1) * Dh
        qh = q[:, lo:hi]                             # (TQ, Dh) bf16
        kh = kv[:, lo:hi]                            # (Nk, Dh) bf16
        vh = kv[:, C + lo:C + hi]                    # (Nk, Dh) bf16

        # q . k^T without materializing the transpose (contract on the Dh axis).
        s = jax.lax.dot_general(qh, kh, (((1,), (1,)), ((), ())),
                                preferred_element_type=jnp.float32)   # (TQ, Nk)
        s = s - jnp.max(s, axis=-1, keepdims=True)
        p = jnp.exp(s)
        inv = pl.reciprocal(jnp.sum(p, axis=-1, keepdims=True), approx=True)  # EUP slot
        oh = jnp.dot(p.astype(jnp.bfloat16), vh, preferred_element_type=jnp.float32)
        acc_ref[:, lo:hi] = oh * inv                 # stream to scratch; frees vregs

    # Fused output projection: one lane-dense (TQ, C) f32 store of the final result.
    heads = acc_ref[...].astype(jnp.bfloat16)        # (TQ, C)
    out = jnp.dot(heads, pw_ref[...], preferred_element_type=jnp.float32) + pb_ref[...]
    o_ref[0] = out.astype(o_ref.dtype)


def attention_proj(q, kv, num_heads, proj_w_bf16, proj_b, *, q_tile=256):
    """q: [B, Nq, C] bf16, kv: [B, Nk, 2C] bf16 -> proj(attn) : [B, Nq, C] f32."""
    B, Nq, C = q.shape
    Nk = kv.shape[1]
    # Tile the query dimension when it divides evenly; otherwise fall back to one block.
    tq = q_tile if (Nq > q_tile and Nq % q_tile == 0) else Nq
    kern = functools.partial(_cross_attn_kernel, num_heads=num_heads)
    return pl.pallas_call(
        kern,
        out_shape=jax.ShapeDtypeStruct((B, Nq, C), jnp.float32),
        grid=(B, Nq // tq),
        in_specs=[pl.BlockSpec((1, tq, C), lambda b, i: (b, i, 0)),
                  pl.BlockSpec((1, Nk, 2 * C), lambda b, i: (b, 0, 0)),
                  pl.BlockSpec((C, C), lambda b, i: (0, 0)),       # proj_w resident
                  pl.BlockSpec((1, C), lambda b, i: (0, 0))],      # proj_b resident
        out_specs=pl.BlockSpec((1, tq, C), lambda b, i: (b, i, 0)),
        scratch_shapes=[pltpu.VMEM((tq, C), jnp.float32)],
        compiler_params=pltpu.CompilerParams(
            dimension_semantics=("parallel", "parallel")),
    )(q, kv, proj_w_bf16, proj_b.reshape(1, C).astype(jnp.float32))


# ----------------------------------------------------------------------------
# CrossAttention.forward (qk_norm=False, dropout inactive at inference)
# ----------------------------------------------------------------------------

def cross_attention_forward(params, x, y, mask=None):
    # TODO(synk): the optional boolean attention mask (masked_fill(-inf)) is not
    #             implemented; only the mask=None path (as used in ReConV2) is supported.
    assert mask is None
    B, Nq, C = x.shape
    Nk = y.shape[1]
    H = params["num_heads"]
    Dh = C // H
    scale = Dh ** (-0.5)

    # Fold the 1/sqrt(Dh) scale into the q projection (free at trace time),
    # cast weights to bf16 once (MXU fast path, half the weight HBM traffic).
    q_w = (params["q_w"] * scale).astype(jnp.bfloat16)
    q_b = params["q_b"] * scale
    kv_w = params["kv_w"].astype(jnp.bfloat16)
    proj_w = params["proj_w"].astype(jnp.bfloat16)

    # Activations in bf16 for the projections (halves activation HBM read traffic).
    x_bf = x.astype(jnp.bfloat16).reshape(B * Nq, C)
    y_bf = y.astype(jnp.bfloat16).reshape(B * Nk, C)

    q = linear(x_bf, q_w, q_b, out_dtype=jnp.bfloat16).reshape(B, Nq, C)
    kv = linear(y_bf, kv_w, params["kv_b"], out_dtype=jnp.bfloat16).reshape(B, Nk, 2 * C)

    # Attention + output projection fused in one kernel (drops the attn_out HBM round trip).
    return attention_proj(q, kv, H, proj_w, params["proj_b"])


# ----------------------------------------------------------------------------
# Pure-JAX fp32 reference (mirrors the PyTorch module exactly)
# ----------------------------------------------------------------------------

def cross_attention_ref(params, x, y):
    B, Nq, C = x.shape
    Nk = y.shape[1]
    H = params["num_heads"]
    Dh = C // H
    scale = Dh ** (-0.5)
    q = (x.reshape(-1, C) @ params["q_w"] + params["q_b"]).reshape(B, Nq, H, Dh)
    q = q.transpose(0, 2, 1, 3)                                    # [B,H,Nq,Dh]
    kv = (y.reshape(-1, C) @ params["kv_w"] + params["kv_b"]).reshape(B, Nk, 2, H, Dh)
    kv = kv.transpose(2, 0, 3, 1, 4)                               # [2,B,H,Nk,Dh]
    k, v = kv[0], kv[1]
    attn = jax.nn.softmax((q * scale) @ jnp.swapaxes(k, -1, -2), axis=-1)
    o = (attn @ v).transpose(0, 2, 1, 3).reshape(B, Nq, C)
    return (o.reshape(-1, C) @ params["proj_w"] + params["proj_b"]).reshape(B, Nq, C)


# ----------------------------------------------------------------------------

if __name__ == "__main__":
    # batch, query tokens, context tokens, dim, heads (layout-friendly small shapes)
    B, Nq, Nk, C, H = 2, 8, 16, 128, 4

    key = jax.random.PRNGKey(0)
    k_x, k_y, kq, kkv, kp, kb1, kb2, kb3 = jax.random.split(key, 8)

    params = dict(
        num_heads=H,
        # Weights stored transposed relative to nn.Linear: [in, out].
        q_w=0.02 * jax.random.normal(kq, (C, C), jnp.float32),
        q_b=0.02 * jax.random.normal(kb1, (C,), jnp.float32),
        kv_w=0.02 * jax.random.normal(kkv, (C, 2 * C), jnp.float32),
        kv_b=0.02 * jax.random.normal(kb2, (2 * C,), jnp.float32),
        proj_w=0.02 * jax.random.normal(kp, (C, C), jnp.float32),
        proj_b=0.02 * jax.random.normal(kb3, (C,), jnp.float32),
    )
    x = jax.random.normal(k_x, (B, Nq, C), jnp.float32)
    y = jax.random.normal(k_y, (B, Nk, C), jnp.float32)

    out = cross_attention_forward(params, x, y, mask=None)
    out = jax.block_until_ready(out)
    assert out.shape == (B, Nq, C)

    ref = cross_attention_ref(params, x, y)
    err = float(jnp.max(jnp.abs(out - ref)))
    assert err < 2e-2, f"max abs err vs fp32 reference: {err}"
    print("KERNEL_OK")
</pallas_src>

<mosaic_0001>
module attributes {stable_mosaic.version = 11 : i64} {
  func.func @_linear_kernel(%arg0: i32, %arg1: memref<16x128xbf16, #tpu.memory_space<vmem>>, %arg2: memref<128x128xbf16, #tpu.memory_space<vmem>>, %arg3: memref<1x128xf32, #tpu.memory_space<vmem>>, %arg4: memref<16x128xbf16, #tpu.memory_space<vmem>>) attributes {dimension_semantics = [#tpu.dimension_semantics<parallel>], iteration_bounds = array<i64: 1>, scalar_prefetch = 0 : i64, scratch_operands = 0 : i64, tpu.core_type = #tpu.core_type<tc>, window_params = [{transform_indices = @transform_0, window_bounds = array<i64: 16, 128>}, {pipeline_mode = #tpu.pipeline_mode<synchronous>, transform_indices = @transform_1, window_bounds = array<i64: 128, 128>}, {pipeline_mode = #tpu.pipeline_mode<synchronous>, transform_indices = @transform_2, window_bounds = array<i64: 1, 128>}, {transform_indices = @transform_3, window_bounds = array<i64: 16, 128>}]} {
    %c0 = arith.constant 0 : index
    %c0_0 = arith.constant 0 : index
    %0 = vector.load %arg1[%c0, %c0_0] : memref<16x128xbf16, #tpu.memory_space<vmem>>, vector<16x128xbf16>
    %c0_1 = arith.constant 0 : index
    %c0_2 = arith.constant 0 : index
    %1 = vector.load %arg2[%c0_1, %c0_2] : memref<128x128xbf16, #tpu.memory_space<vmem>>, vector<128x128xbf16>
    %cst = arith.constant dense<0.000000e+00> : vector<16x128xf32>
    %2 = tpu.matmul %0, %1, %cst {dimension_numbers = #tpu.dot_dimension_numbers<[1], [0], [0], [1], [0, 0, 1, 1], [], []>} : vector<16x128xbf16>, vector<128x128xbf16>, vector<16x128xf32> -> vector<16x128xf32>
    %c0_3 = arith.constant 0 : index
    %c0_4 = arith.constant 0 : index
    %3 = vector.load %arg3[%c0_3, %c0_4] : memref<1x128xf32, #tpu.memory_space<vmem>>, vector<1x128xf32>
    %4 = vector.broadcast %3 : vector<1x128xf32> to vector<16x128xf32>
    %5 = arith.addf %2, %4 : vector<16x128xf32>
    %6 = arith.truncf %5 : vector<16x128xf32> to vector<16x128xbf16>
    %c0_5 = arith.constant 0 : index
    %c0_6 = arith.constant 0 : index
    %7 = vector.load %arg4[%c0_5, %c0_6] : memref<16x128xbf16, #tpu.memory_space<vmem>>, vector<16x128xbf16>
    tpu.vector_store %arg4[%c0_5, %c0_6], %6 {strides = array<i32>} : memref<16x128xbf16, #tpu.memory_space<vmem>>, vector<16x128xbf16>,
    return
  }
  func.func @transform_0(%arg0: i32) -> (i32, i32) {
    %c0_i32 = arith.constant 0 : i32
    %c0_i32_0 = arith.constant 0 : i32
    return %arg0, %c0_i32 : i32, i32
  }
  func.func @transform_1(%arg0: i32) -> (i32, i32) {
    %c0_i32 = arith.constant 0 : i32
    %c0_i32_0 = arith.constant 0 : i32
    %c0_i32_1 = arith.constant 0 : i32
    return %c0_i32, %c0_i32_0 : i32, i32
  }
  func.func @transform_2(%arg0: i32) -> (i32, i32) {
    %c0_i32 = arith.constant 0 : i32
    %c0_i32_0 = arith.constant 0 : i32
    %c0_i32_1 = arith.constant 0 : i32
    return %c0_i32, %c0_i32_0 : i32, i32
  }
  func.func @transform_3(%arg0: i32) -> (i32, i32) {
    %c0_i32 = arith.constant 0 : i32
    %c0_i32_0 = arith.constant 0 : i32
    return %arg0, %c0_i32 : i32, i32
  }
}

</mosaic_0001>

<bundles_post_ra>
// kernel: tpu_custom_call.1
= control target key start
LH: loop header
LB: loop body
LE: loop exit
PB: predicated region body
PF: predicated region fallthrough
CT: control target
= control target key end

     0   :  { %8 = vsyncpa [#allocation3], 0  ;;  %s370_s0 = inlined_call_operand.hbm [shape: bf16[16,128], index: 0, kind: input, shape index: {}]   ;;  %s371_s1 = inlined_call_operand.hbm [shape: bf16[128,128], index: 1, kind: input, shape index: {}]   ;;  %s372_s2 = inlined_call_operand.vmem [shape: f32[1,128], index: 2, kind: input, shape index: {}]   ;;  %s373_s3 = inlined_call_operand.hbm [shape: bf16[16,128], index: 3, kind: output, shape index: {}]  }
   0x1   :  { %9 = vsyncpa [#allocation6], 0 }
   0x2   :  { %10 = vsyncpa [#allocation4], 0  ;;  %s322_s12 = smov [#allocation2]  }
   0x3   :  { %s16_s13 = sshll.u32 %s322_s12, 4  ;;  %s17_s13 = int_to_ptr.vmem [resolvable:$true] %s16_s13 }
   0x4   :  { %s264_s14 = scalar_lea.vmem %s17_s13, 128  ;;  %p269_p1 = scmp.lt.s32.totalorder %s17_s13, %s17_s13 }
   0x5   :  { %p265_p0 = scmp.ne.s32.totalorder %s17_s13, %s264_s14  ;;  %p270_p2 = scmp.lt.s32.totalorder %s264_s14, %s264_s14 }
   0x7   :  { %p271_p3 = por %p270_p2, %p269_p1 }
   0x9   :  { %p272_p4 = pnand %p271_p3, %p265_p0 }
   0xb   :  { %275 = shalt.err (!%p272_p4)
}
   0xc   :  { %s323_s15 = smov 64   ;;  %s324_s16 = smov 4  }
   0xd   :  { %22 = dma.hbm_to_vmem [thread:$0]  %s370_s0, 128, %s17_s13, [#allocation3], %s323_s15, %s323_s15, %s324_s16  }
   0xe   :  { %s325_s19 = smov [#allocation5]  }
   0xf   :  { %s28_s20 = sshll.u32 %s325_s19, 4  ;;  %s29_s20 = int_to_ptr.vmem [resolvable:$true] %s28_s20 }
  0x10   :  { %s284_s21 = scalar_lea.vmem %s29_s20, 1024  ;;  %p289_p6 = scmp.lt.s32.totalorder %s29_s20, %s29_s20 }
  0x11   :  { %p285_p5 = scmp.ne.s32.totalorder %s29_s20, %s284_s21  ;;  %p290_p7 = scmp.lt.s32.totalorder %s284_s21, %s284_s21 }
  0x13   :  { %p291_p8 = por %p290_p7, %p289_p6 }
  0x15   :  { %p292_p9 = pnand %p291_p8, %p285_p5 }
  0x17   :  { %295 = shalt.err (!%p292_p9)
}
  0x18   :  { %34 = dma.hbm_to_vmem [thread:$0]  %s371_s1, 1024, %s29_s20, [#allocation6], %s323_s15, %s323_s15, %s324_s16  }
  0x19   :  { %316 = dma.done.wait [#allocation3], 128  }
  0x1a   :  { %317 = vsyncadd [#allocation3], 4294967168 }
  0x1b   :  { %318 = dma.done.wait [#allocation6], 1024  }
  0x1c   :  { %319 = vsyncadd [#allocation6], 4294966272  ;;  %v326_v0 = vmov 0.0   ;;  %vm327_vm0 = vmmov 0   ;;  %v247_v1 = vld [vmem:[#allocation5 + $0x38] sm:$0xff]   ;;  %v248_v2 = vld [vmem:[#allocation5 + $0x30] sm:$0xff]  }
  0x1d   :  { %220 = vmatprep.subr.bf16.mxu0 %v326_v0  ;;  %236 = vmatprep.mubr.msk.bf16.mxu0 %vm327_vm0, %v326_v0  ;;  %v249_v3 = vld [vmem:[#allocation5 + $0x28] sm:$0xff]   ;;  %v250_v4 = vld [vmem:[#allocation5 + $0x20] sm:$0xff]   ;;  %v251_v5 = vld [vmem:[#allocation5 + $0x18] sm:$0xff]   ;;  %s328_s24 = smov [#allocation7]  }
  0x1e   :  { %221 = vmatpush3.bf16.msra.mxu0 %v247_v1  ;;  %v252_v6 = vld [vmem:[#allocation5 + $0x10] sm:$0xff]   ;;  %v253_v7 = vld [vmem:[#allocation5 + $0x8] sm:$0xff]   ;;  %v254_v8 = vld [vmem:[#allocation5] sm:$0xff]   ;;  %s179_s25 = sshll.u32 %s328_s24, 4  ;;  %s180_s25 = int_to_ptr.vmem [resolvable:$true] %s179_s25 }
  0x1f   :  { %222 = vmatprep.subr.bf16.mxu0 %v326_v0  ;;  %v255_v9 = vld [vmem:[#allocation2] sm:$0xff]   ;;  %s296_s26 = scalar_lea.vmem %s180_s25, 128  ;;  %p301_p11 = scmp.lt.s32.totalorder %s180_s25, %s180_s25 }
  0x20   :  { %v192_v11 = vld [vmem:[%s372_s2] ss:$0 sm:$0xff]  ;;  %p297_p10 = scmp.ne.s32.totalorder %s180_s25, %s296_s26  ;;  %p302_p12 = scmp.lt.s32.totalorder %s296_s26, %s296_s26 }
  0x22   :  { %223 = vmatpush3.bf16.msra.mxu0 %v248_v2  ;;  %p303_p13 = por %p302_p12, %p301_p11 }
  0x23   :  { %224 = vmatprep.subr.bf16.mxu0 %v326_v0 }
  0x24   :  { %p304_p0 = pnand %p303_p13, %p297_p10 }
  0x26   :  { %225 = vmatpush3.bf16.msra.mxu0 %v249_v3 }
  0x27   :  { %226 = vmatprep.subr.bf16.mxu0 %v326_v0 }
  0x2a   :  { %227 = vmatpush3.bf16.msra.mxu0 %v250_v4 }
  0x2b   :  { %228 = vmatprep.subr.bf16.mxu0 %v326_v0 }
  0x2e   :  { %229 = vmatpush3.bf16.msra.mxu0 %v251_v5 }
  0x2f   :  { %230 = vmatprep.subr.bf16.mxu0 %v326_v0 }
  0x32   :  { %231 = vmatpush3.bf16.msra.mxu0 %v252_v6 }
  0x33   :  { %232 = vmatprep.subr.bf16.mxu0 %v326_v0 }
  0x36   :  { %233 = vmatpush3.bf16.msra.mxu0 %v253_v7 }
  0x37   :  { %234 = vmatprep.subr.bf16.mxu0 %v326_v0 }
  0x3a   :  { %235 = vmatpush3.bf16.msra.mxu0 %v254_v8 }
  0x3d   :  { %237 = vmatmul.mubr.bf16.vlgmr.msra.gmra.mxu0 %v255_v9 }
  0xfd   :  { %v157_v10 = vpop.f32.mrf.mxu0 }
  0xfe   :  { %v158_v14 = vadd.f32 %v192_v11, %v157_v10 }
  0xff   :  { %v238_v12 = vpop.f32.mrf.mxu0 }
 0x101   :  { %v160_v13 = vpop.f32.mrf.mxu0 }
 0x102   :  { %v161_v15 = vadd.f32 %v192_v11, %v160_v13 }
 0x103   :  { %v239_v16 = vpop.f32.mrf.mxu0 }
 0x104   :  { %v209_v17 = vpack.c.bf16 %v161_v15, %v158_v14 }
 0x106   :  { %210 = vst [vmem:[#allocation7] sm:$0xff] %v209_v17  }
 0x107   :  { %307 = shalt.err (!%p304_p0)
}
 0x108   :  { %185 = dma.vmem_to_hbm [thread:$0]  %s180_s25, 128, %s373_s3, [#allocation4], %s323_s15, %s323_s15, %s324_s16  }
 0x109   :  { %320 = dma.done.wait [#allocation4], 128  }
 0x10a   :  { %321 = vsyncadd [#allocation4], 4294967168 }
 0x10b   :  { %189 = vsyncpa [#allocation3], 1 }
 0x10c   :  { %190 = vsyncpa [#allocation6], 1 }
 0x10d   :  { %191 = vsyncpa [#allocation4], 1 }

</bundles_post_ra>
